<compile_context>
chip_gen: v5e
topology: v5e:2x2
jax: 0.10.0
libtpu: 0.0.40
codegen_flags: <defaults>
</compile_context>

<pallas_src>
import functools
import math

import jax
import jax.numpy as jnp
from jax import lax
from jax.experimental import pallas as pl
from jax.experimental.pallas import tpu as pltpu

_VMEM_LIMIT_BYTES = 40 * 1024 * 1024   # explicit scoped-VMEM budget (v7x-safe)


def _round_up(a, b):
    return ((a + b - 1) // b) * b


def _gelu_tanh(x):
    # torch.nn.functional.gelu(x, approximate='tanh')
    c = math.sqrt(2.0 / math.pi)
    return 0.5 * x * (1.0 + jnp.tanh(c * (x + 0.044715 * x * x * x)))


def _layernorm_f32(x_f32, gamma_f32, beta_f32, eps):
    mu = jnp.mean(x_f32, axis=-1, keepdims=True)
    var = jnp.mean(jnp.square(x_f32 - mu), axis=-1, keepdims=True)
    return (x_f32 - mu) * lax.rsqrt(var + eps) * gamma_f32 + beta_f32


# --------------------------------------------------------------------------- #
# Kernel A: LN1 + fused QKV projection (one (H, 3H) matmul, lane-dense output)
# --------------------------------------------------------------------------- #
def _ln1_qkv_kernel(x_ref, g_ref, b_ref, w_ref, bqkv_ref, qkv_ref, *, eps):
    x = x_ref[...].astype(jnp.float32)
    xn = _layernorm_f32(x, g_ref[...].astype(jnp.float32),
                        b_ref[...].astype(jnp.float32), eps)
    xn = xn.astype(x_ref.dtype)          # native-dtype MXU operand (bf16 stays bf16)
    qkv_ref[...] = (jnp.dot(xn, w_ref[...], preferred_element_type=jnp.float32)
                    + bqkv_ref[...].astype(jnp.float32)).astype(qkv_ref.dtype)


# --------------------------------------------------------------------------- #
# Kernel B: attention + out_proj + first residual, fused.
# Grid = (batch [parallel], head-groups [arbitrary, last]).
# G heads per step are processed with a bounded in-kernel loop; each head's
# o_h @ Wo[h] is accumulated into an (S, H) f32 VMEM scratch.
# SigLIP sequences are short (<= 729 patches) so the full S x S score matrix
# fits VMEM.  TODO(synk): flash-style KV tiling if S grows beyond ~2K.
# --------------------------------------------------------------------------- #
def _attn_outproj_kernel(q_ref, k_ref, v_ref, wo_ref, bo_ref, r_ref, o_ref,
                         acc_sc, *, scale, heads_per_step):
    hg = pl.program_id(1)

    @pl.when(hg == 0)
    def _init():
        acc_sc[...] = jnp.zeros_like(acc_sc)

    @pl.loop(0, heads_per_step)            # bounded loop -> bounded live ranges
    def _per_head(g):
        q = q_ref[g]                        # (S, d) native dtype -> full MXU rate
        k = k_ref[g]
        v = v_ref[g]
        # scale applied to f32 scores (matches torch semantics, free on VPU)
        s = lax.dot_general(q, k, (((1,), (1,)), ((), ())),
                            preferred_element_type=jnp.float32) * scale
        m = jnp.max(s, axis=-1, keepdims=True)
        p = jnp.exp(s - m)                  # unnormalized (deferred normalization)
        l = jnp.sum(p, axis=-1, keepdims=True)
        o = jnp.dot(p.astype(v_ref.dtype), v, preferred_element_type=jnp.float32)
        o = o * pl.reciprocal(l, approx=True)      # S*d mul + EUP recip, no S*S divide
        acc_sc[...] += jnp.dot(o.astype(wo_ref.dtype), wo_ref[g],
                               preferred_element_type=jnp.float32)

    @pl.when(hg == pl.num_programs(1) - 1)
    def _finalize():
        o_ref[...] = (acc_sc[...] + bo_ref[...].astype(jnp.float32)
                      + r_ref[...].astype(jnp.float32)).astype(o_ref.dtype)


# --------------------------------------------------------------------------- #
# Kernel C: LN2 + MLP (fc1 -> tanh-GELU -> fc2) + second residual add.
# Grid = (row tiles [parallel], intermediate tiles [arbitrary, last]).
# --------------------------------------------------------------------------- #
def _ln2_mlp_residual_kernel(x_ref, g_ref, be_ref,
                             w1_ref, b1_ref, w2_ref, b2_ref,
                             o_ref, xn_sc, acc_sc, *, eps):
    ki = pl.program_id(1)

    @pl.when(ki == 0)
    def _init():
        x = x_ref[...].astype(jnp.float32)
        xn = _layernorm_f32(x, g_ref[...].astype(jnp.float32),
                            be_ref[...].astype(jnp.float32), eps)
        xn_sc[...] = xn.astype(xn_sc.dtype)     # stored in MXU-operand dtype
        acc_sc[...] = jnp.zeros_like(acc_sc)

    h = jnp.dot(xn_sc[...], w1_ref[...], preferred_element_type=jnp.float32)
    h = _gelu_tanh(h + b1_ref[...].astype(jnp.float32))       # f32 GELU (v5e-safe)
    acc_sc[...] += jnp.dot(h.astype(w2_ref.dtype), w2_ref[...],
                           preferred_element_type=jnp.float32)

    @pl.when(ki == pl.num_programs(1) - 1)
    def _finalize():
        y = (acc_sc[...] + b2_ref[...].astype(jnp.float32)
             + x_ref[...].astype(jnp.float32))
        o_ref[...] = y.astype(o_ref.dtype)


# --------------------------------------------------------------------------- #
# Wrapper
# --------------------------------------------------------------------------- #
@functools.partial(jax.jit, static_argnames=("num_heads", "eps", "tm", "tm_mlp",
                                              "ti", "heads_per_step"))
def siglip_encoder_layer(hidden_states,
                         ln1_g, ln1_b,
                         wq, bq, wk, bk, wv, bv, wo, bo,
                         ln2_g, ln2_b,
                         w1, b1, w2, b2,
                         *, num_heads, eps=1e-6, tm=256, tm_mlp=512, ti=1024,
                         heads_per_step=8):
    """hidden_states: [B, S, H]; weights in [in, out] convention."""
    B, S, H = hidden_states.shape
    assert H % num_heads == 0
    d = H // num_heads
    I = w1.shape[1]
    dtype = hidden_states.dtype
    M = B * S

    # heads processed per attention grid step: largest divisor of NH <= requested
    G = max(g for g in range(1, num_heads + 1)
            if num_heads % g == 0 and g <= heads_per_step)

    # ------------------------------------------------------------------ A
    tm_a = min(tm, _round_up(M, 8))
    M_pad_a = _round_up(M, tm_a)
    x2d = hidden_states.reshape(M, H)
    x_pad = jnp.pad(x2d, ((0, M_pad_a - M), (0, 0))) if M_pad_a != M else x2d

    wqkv = jnp.concatenate([wq, wk, wv], axis=1)               # (H, 3H)
    bqkv = jnp.concatenate([bq, bk, bv]).reshape(1, 3 * H)
    g1, be1 = ln1_g.reshape(1, H), ln1_b.reshape(1, H)

    qkv2d = pl.pallas_call(
        functools.partial(_ln1_qkv_kernel, eps=eps),
        out_shape=jax.ShapeDtypeStruct((M_pad_a, 3 * H), dtype),
        grid_spec=pltpu.PrefetchScalarGridSpec(
            num_scalar_prefetch=0,
            grid=(M_pad_a // tm_a,),
            in_specs=[pl.BlockSpec((tm_a, H), lambda i: (i, 0)),
                      pl.BlockSpec((1, H), lambda i: (0, 0)),
                      pl.BlockSpec((1, H), lambda i: (0, 0)),
                      pl.BlockSpec((H, 3 * H), lambda i: (0, 0)),
                      pl.BlockSpec((1, 3 * H), lambda i: (0, 0))],
            out_specs=pl.BlockSpec((tm_a, 3 * H), lambda i: (i, 0)),
        ),
        compiler_params=pltpu.CompilerParams(
            dimension_semantics=("parallel",),
            vmem_limit_bytes=_VMEM_LIMIT_BYTES),
    )(x_pad, g1, be1, wqkv, bqkv)

    # Head split: single wrapper transpose (the head-MERGE transpose and the attn
    # HBM round trip are fused away inside kernel B).
    # TODO(synk): fold this split into kernel A's output layout to kill the last
    # layout round trip (needs an in-kernel (ts,NH,d)->(NH,ts,d) relayout).
    qkv = qkv2d[:M].reshape(B, S, 3, num_heads, d).transpose(2, 0, 3, 1, 4)
    qh, kh, vh = qkv[0], qkv[1], qkv[2]                        # (B, NH, S, d)

    # ------------------------------------------------------------------ B
    wo3 = wo.reshape(num_heads, d, H)                          # per-head Wo slabs
    bo2 = bo.reshape(1, H)
    qkv_spec = pl.BlockSpec((None, G, S, d), lambda b, hg: (b, hg, 0, 0))
    bsh_spec = pl.BlockSpec((None, S, H), lambda b, hg: (b, 0, 0))

    h1 = pl.pallas_call(
        functools.partial(_attn_outproj_kernel, scale=d ** -0.5, heads_per_step=G),
        out_shape=jax.ShapeDtypeStruct((B, S, H), dtype),
        grid_spec=pltpu.PrefetchScalarGridSpec(
            num_scalar_prefetch=0,
            grid=(B, num_heads // G),                          # head groups last
            in_specs=[qkv_spec, qkv_spec, qkv_spec,
                      pl.BlockSpec((G, d, H), lambda b, hg: (hg, 0, 0)),
                      pl.BlockSpec((1, H), lambda b, hg: (0, 0)),
                      bsh_spec],                               # residual x
            out_specs=bsh_spec,
            scratch_shapes=[pltpu.VMEM((S, H), jnp.float32)],  # out_proj accumulator
        ),
        compiler_params=pltpu.CompilerParams(
            dimension_semantics=("parallel", "arbitrary"),
            vmem_limit_bytes=_VMEM_LIMIT_BYTES),
    )(qh, kh, vh, wo3, bo2, hidden_states)

    # ------------------------------------------------------------------ C (MLP)
    tm_d = min(tm_mlp, _round_up(M, 8))            # bigger tile -> fewer W1/W2 passes
    M_pad_d = _round_up(M, tm_d)
    h1_2d = h1.reshape(M, H)
    h1_pad = jnp.pad(h1_2d, ((0, M_pad_d - M), (0, 0))) if M_pad_d != M else h1_2d

    I_128 = _round_up(I, 128)
    n_ksteps = pl.cdiv(I_128, ti)
    mult = 256 if (I_128 % 256 == 0 and ti % 256 == 0) else 128   # MXU-friendly tiles
    ti_eff = _round_up(pl.cdiv(I_128, n_ksteps), mult)
    I_pad = ti_eff * n_ksteps
    if I_pad != I:
        w1_p = jnp.pad(w1, ((0, 0), (0, I_pad - I)))   # zero cols -> gelu(0)=0
        b1_p = jnp.pad(b1, ((0, I_pad - I),))
        w2_p = jnp.pad(w2, ((0, I_pad - I), (0, 0)))   # zero rows -> 0 contribution
    else:
        w1_p, b1_p, w2_p = w1, b1, w2

    g2, be2 = ln2_g.reshape(1, H), ln2_b.reshape(1, H)
    b1_2d = b1_p.reshape(1, I_pad)
    b2_2d = b2.reshape(1, H)

    out_pad = pl.pallas_call(
        functools.partial(_ln2_mlp_residual_kernel, eps=eps),
        out_shape=jax.ShapeDtypeStruct((M_pad_d, H), dtype),
        grid_spec=pltpu.PrefetchScalarGridSpec(
            num_scalar_prefetch=0,
            grid=(M_pad_d // tm_d, n_ksteps),
            in_specs=[
                pl.BlockSpec((tm_d, H), lambda i, k: (i, 0)),     # post-attn hidden
                pl.BlockSpec((1, H), lambda i, k: (0, 0)),        # ln2 gamma
                pl.BlockSpec((1, H), lambda i, k: (0, 0)),        # ln2 beta
                pl.BlockSpec((H, ti_eff), lambda i, k: (0, k)),   # W1 column tile
                pl.BlockSpec((1, ti_eff), lambda i, k: (0, k)),   # b1 tile
                pl.BlockSpec((ti_eff, H), lambda i, k: (k, 0)),   # W2 row tile
                pl.BlockSpec((1, H), lambda i, k: (0, 0)),        # b2
            ],
            out_specs=pl.BlockSpec((tm_d, H), lambda i, k: (i, 0)),
            scratch_shapes=[
                pltpu.VMEM((tm_d, H), dtype),        # LN2(x) in MXU operand dtype
                pltpu.VMEM((tm_d, H), jnp.float32),  # fc2 accumulator
            ],
        ),
        compiler_params=pltpu.CompilerParams(
            dimension_semantics=("parallel", "arbitrary"),
            vmem_limit_bytes=_VMEM_LIMIT_BYTES),
    )(h1_pad, g2, be2, w1_p, b1_2d, w2_p, b2_2d)

    return out_pad[:M].reshape(B, S, H)


# --------------------------------------------------------------------------- #
# Pure-JAX reference (matches PyTorch SiglipEncoderLayer semantics)
# --------------------------------------------------------------------------- #
def siglip_encoder_layer_reference(x, ln1_g, ln1_b,
                                   wq, bq, wk, bk, wv, bv, wo, bo,
                                   ln2_g, ln2_b, w1, b1, w2, b2,
                                   *, num_heads, eps=1e-6):
    B, S, H = x.shape
    d = H // num_heads

    def ln(t, g, b):
        t32 = t.astype(jnp.float32)
        mu = jnp.mean(t32, axis=-1, keepdims=True)
        var = jnp.mean(jnp.square(t32 - mu), axis=-1, keepdims=True)
        return ((t32 - mu) * lax.rsqrt(var + eps) * g + b).astype(t.dtype)

    residual = x
    h = ln(x, ln1_g, ln1_b)
    q = (h @ wq + bq).reshape(B, S, num_heads, d).transpose(0, 2, 1, 3)
    k = (h @ wk + bk).reshape(B, S, num_heads, d).transpose(0, 2, 1, 3)
    v = (h @ wv + bv).reshape(B, S, num_heads, d).transpose(0, 2, 1, 3)
    s = jnp.einsum("bhqd,bhkd->bhqk", q, k) * (d ** -0.5)
    p = jax.nn.softmax(s.astype(jnp.float32), axis=-1).astype(q.dtype)
    o = jnp.einsum("bhqk,bhkd->bhqd", p, v)
    o = o.transpose(0, 2, 1, 3).reshape(B, S, H)
    h = residual + (o @ wo + bo)

    residual = h
    h2 = ln(h, ln2_g, ln2_b)
    h2 = _gelu_tanh(h2 @ w1 + b1)
    h2 = h2 @ w2 + b2
    return residual + h2


if __name__ == "__main__":
    # Small config consistent with SiglipVisionConfig (hidden divisible by heads).
    batch, seq = 2, 8
    hidden, intermediate, num_heads = 32, 512, 4

    key = jax.random.PRNGKey(0)
    ks = jax.random.split(key, 18)

    x = jax.random.normal(ks[0], (batch, seq, hidden), dtype=jnp.float32)

    def lin(kw, kb, fan_in, fan_out):
        w = jax.random.normal(kw, (fan_in, fan_out), jnp.float32) * 0.02
        b = jax.random.normal(kb, (fan_out,), jnp.float32) * 0.02
        return w, b

    ln1_g = jnp.ones((hidden,), jnp.float32) + 0.01 * jax.random.normal(ks[1], (hidden,))
    ln1_b = 0.01 * jax.random.normal(ks[2], (hidden,))
    ln2_g = jnp.ones((hidden,), jnp.float32) + 0.01 * jax.random.normal(ks[3], (hidden,))
    ln2_b = 0.01 * jax.random.normal(ks[4], (hidden,))

    wq, bq = lin(ks[5], ks[6], hidden, hidden)
    wk, bk = lin(ks[7], ks[8], hidden, hidden)
    wv, bv = lin(ks[9], ks[10], hidden, hidden)
    wo, bo = lin(ks[11], ks[12], hidden, hidden)
    w1, b1 = lin(ks[13], ks[14], hidden, intermediate)
    w2, b2 = lin(ks[15], ks[16], intermediate, hidden)

    params = (ln1_g, ln1_b, wq, bq, wk, bk, wv, bv, wo, bo,
              ln2_g, ln2_b, w1, b1, w2, b2)

    # ti=256 / heads_per_step=2 exercise the multi-step reduction paths of the
    # MLP kernel (intermediate tiles) and the fused attention kernel (head groups).
    out = siglip_encoder_layer(x, *params, num_heads=num_heads,
                               ti=256, heads_per_step=2)
    out = jax.block_until_ready(out)

    ref = siglip_encoder_layer_reference(x, *params, num_heads=num_heads)
    assert out.shape == (batch, seq, hidden)
    assert jnp.allclose(out, ref, atol=1e-4, rtol=1e-4), "mismatch vs reference"

    print("KERNEL_OK")
</pallas_src>

<mosaic_0001>
module attributes {stable_mosaic.version = 11 : i64} {
  func.func @_ln1_qkv_kernel(%arg0: i32, %arg1: memref<16x32xf32, #tpu.memory_space<vmem>>, %arg2: memref<1x32xf32, #tpu.memory_space<vmem>>, %arg3: memref<1x32xf32, #tpu.memory_space<vmem>>, %arg4: memref<32x96xf32, #tpu.memory_space<vmem>>, %arg5: memref<1x96xf32, #tpu.memory_space<vmem>>, %arg6: memref<16x96xf32, #tpu.memory_space<vmem>>) attributes {dimension_semantics = [#tpu.dimension_semantics<parallel>], iteration_bounds = array<i64: 1>, scalar_prefetch = 0 : i64, scratch_operands = 0 : i64, tpu.core_type = #tpu.core_type<tc>, window_params = [{transform_indices = @transform_0, window_bounds = array<i64: 16, 32>}, {pipeline_mode = #tpu.pipeline_mode<synchronous>, transform_indices = @transform_1, window_bounds = array<i64: 1, 32>}, {pipeline_mode = #tpu.pipeline_mode<synchronous>, transform_indices = @transform_2, window_bounds = array<i64: 1, 32>}, {pipeline_mode = #tpu.pipeline_mode<synchronous>, transform_indices = @transform_3, window_bounds = array<i64: 32, 96>}, {pipeline_mode = #tpu.pipeline_mode<synchronous>, transform_indices = @transform_4, window_bounds = array<i64: 1, 96>}, {transform_indices = @transform_5, window_bounds = array<i64: 16, 96>}]} {
    %c0 = arith.constant 0 : index
    %c0_0 = arith.constant 0 : index
    %0 = vector.load %arg1[%c0, %c0_0] : memref<16x32xf32, #tpu.memory_space<vmem>>, vector<16x32xf32>
    %c0_1 = arith.constant 0 : index
    %c0_2 = arith.constant 0 : index
    %1 = vector.load %arg2[%c0_1, %c0_2] : memref<1x32xf32, #tpu.memory_space<vmem>>, vector<1x32xf32>
    %c0_3 = arith.constant 0 : index
    %c0_4 = arith.constant 0 : index
    %2 = vector.load %arg3[%c0_3, %c0_4] : memref<1x32xf32, #tpu.memory_space<vmem>>, vector<1x32xf32>
    %cst = arith.constant dense<0.000000e+00> : vector<16xf32>
    %3 = vector.multi_reduction <add>, %0, %cst [1] : vector<16x32xf32> to vector<16xf32>
    %4 = vector.shape_cast %3 : vector<16xf32> to vector<16x1xf32>
    %cst_5 = arith.constant 3.200000e+01 : f32
    %5 = vector.broadcast %cst_5 : f32 to vector<16x1xf32>
    %6 = arith.divf %4, %5 : vector<16x1xf32>
    %7 = vector.broadcast %6 : vector<16x1xf32> to vector<16x32xf32>
    %8 = arith.subf %0, %7 : vector<16x32xf32>
    %9 = arith.mulf %8, %8 : vector<16x32xf32>
    %cst_6 = arith.constant dense<0.000000e+00> : vector<16xf32>
    %10 = vector.multi_reduction <add>, %9, %cst_6 [1] : vector<16x32xf32> to vector<16xf32>
    %11 = vector.shape_cast %10 : vector<16xf32> to vector<16x1xf32>
    %cst_7 = arith.constant 3.200000e+01 : f32
    %12 = vector.broadcast %cst_7 : f32 to vector<16x1xf32>
    %13 = arith.divf %11, %12 : vector<16x1xf32>
    %14 = vector.broadcast %6 : vector<16x1xf32> to vector<16x32xf32>
    %15 = arith.subf %0, %14 : vector<16x32xf32>
    %cst_8 = arith.constant 9.99999997E-7 : f32
    %16 = vector.broadcast %cst_8 : f32 to vector<16x1xf32>
    %17 = arith.addf %13, %16 : vector<16x1xf32>
    %18 = math.rsqrt %17 : vector<16x1xf32>
    %19 = vector.broadcast %18 : vector<16x1xf32> to vector<16x32xf32>
    %20 = arith.mulf %15, %19 : vector<16x32xf32>
    %21 = vector.broadcast %1 : vector<1x32xf32> to vector<16x32xf32>
    %22 = arith.mulf %20, %21 : vector<16x32xf32>
    %23 = vector.broadcast %2 : vector<1x32xf32> to vector<16x32xf32>
    %24 = arith.addf %22, %23 : vector<16x32xf32>
    %c0_9 = arith.constant 0 : index
    %c0_10 = arith.constant 0 : index
    %25 = vector.load %arg4[%c0_9, %c0_10] : memref<32x96xf32, #tpu.memory_space<vmem>>, vector<32x96xf32>
    %cst_11 = arith.constant dense<0.000000e+00> : vector<16x96xf32>
    %26 = tpu.matmul %24, %25, %cst_11 {dimension_numbers = #tpu.dot_dimension_numbers<[1], [0], [0], [1], [0, 0, 1, 1], [], []>} : vector<16x32xf32>, vector<32x96xf32>, vector<16x96xf32> -> vector<16x96xf32>
    %c0_12 = arith.constant 0 : index
    %c0_13 = arith.constant 0 : index
    %27 = vector.load %arg5[%c0_12, %c0_13] : memref<1x96xf32, #tpu.memory_space<vmem>>, vector<1x96xf32>
    %28 = vector.broadcast %27 : vector<1x96xf32> to vector<16x96xf32>
    %29 = arith.addf %26, %28 : vector<16x96xf32>
    %c0_14 = arith.constant 0 : index
    %c0_15 = arith.constant 0 : index
    %30 = vector.load %arg6[%c0_14, %c0_15] : memref<16x96xf32, #tpu.memory_space<vmem>>, vector<16x96xf32>
    tpu.vector_store %arg6[%c0_14, %c0_15], %29 {strides = array<i32>} : memref<16x96xf32, #tpu.memory_space<vmem>>, vector<16x96xf32>,
    return
  }
  func.func @transform_0(%arg0: i32) -> (i32, i32) {
    %c0_i32 = arith.constant 0 : i32
    %c0_i32_0 = arith.constant 0 : i32
    return %arg0, %c0_i32 : i32, i32
  }
  func.func @transform_1(%arg0: i32) -> (i32, i32) {
    %c0_i32 = arith.constant 0 : i32
    %c0_i32_0 = arith.constant 0 : i32
    %c0_i32_1 = arith.constant 0 : i32
    return %c0_i32, %c0_i32_0 : i32, i32
  }
  func.func @transform_2(%arg0: i32) -> (i32, i32) {
    %c0_i32 = arith.constant 0 : i32
    %c0_i32_0 = arith.constant 0 : i32
    %c0_i32_1 = arith.constant 0 : i32
    return %c0_i32, %c0_i32_0 : i32, i32
  }
  func.func @transform_3(%arg0: i32) -> (i32, i32) {
    %c0_i32 = arith.constant 0 : i32
    %c0_i32_0 = arith.constant 0 : i32
    %c0_i32_1 = arith.constant 0 : i32
    return %c0_i32, %c0_i32_0 : i32, i32
  }
  func.func @transform_4(%arg0: i32) -> (i32, i32) {
    %c0_i32 = arith.constant 0 : i32
    %c0_i32_0 = arith.constant 0 : i32
    %c0_i32_1 = arith.constant 0 : i32
    return %c0_i32, %c0_i32_0 : i32, i32
  }
  func.func @transform_5(%arg0: i32) -> (i32, i32) {
    %c0_i32 = arith.constant 0 : i32
    %c0_i32_0 = arith.constant 0 : i32
    return %arg0, %c0_i32 : i32, i32
  }
}

module attributes {stable_mosaic.version = 11 : i64} {
  func.func @_attn_outproj_kernel(%arg0: i32, %arg1: i32, %arg2: memref<1x2x8x8xf32, #tpu.memory_space<vmem>>, %arg3: memref<1x2x8x8xf32, #tpu.memory_space<vmem>>, %arg4: memref<1x2x8x8xf32, #tpu.memory_space<vmem>>, %arg5: memref<2x8x32xf32, #tpu.memory_space<vmem>>, %arg6: memref<1x32xf32, #tpu.memory_space<vmem>>, %arg7: memref<1x8x32xf32, #tpu.memory_space<vmem>>, %arg8: memref<1x8x32xf32, #tpu.memory_space<vmem>>, %arg9: memref<8x32xf32, #tpu.memory_space<vmem>>) attributes {dimension_semantics = [#tpu.dimension_semantics<parallel>, #tpu.dimension_semantics<arbitrary>], iteration_bounds = array<i64: 2, 2>, scalar_prefetch = 0 : i64, scratch_operands = 1 : i64, tpu.core_type = #tpu.core_type<tc>, window_params = [{transform_indices = @transform_0, window_bounds = array<i64: 1, 2, 8, 8>}, {transform_indices = @transform_1, window_bounds = array<i64: 1, 2, 8, 8>}, {transform_indices = @transform_2, window_bounds = array<i64: 1, 2, 8, 8>}, {transform_indices = @transform_3, window_bounds = array<i64: 2, 8, 32>}, {pipeline_mode = #tpu.pipeline_mode<synchronous>, transform_indices = @transform_4, window_bounds = array<i64: 1, 32>}, {transform_indices = @transform_5, window_bounds = array<i64: 1, 8, 32>}, {transform_indices = @transform_6, window_bounds = array<i64: 1, 8, 32>}]} {
    %c0_i32 = arith.constant 0 : i32
    %0 = arith.cmpi eq, %arg1, %c0_i32 : i32
    %1 = arith.extui %0 : i1 to i32
    %c0_i32_0 = arith.constant 0 : i32
    %2 = arith.cmpi ne, %1, %c0_i32_0 : i32
    scf.if %2 {
      %cst = arith.constant 0.000000e+00 : f32
      %7 = vector.broadcast %cst : f32 to vector<8x32xf32>
      %c0 = arith.constant 0 : index
      %c0_5 = arith.constant 0 : index
      %8 = vector.load %arg9[%c0, %c0_5] : memref<8x32xf32, #tpu.memory_space<vmem>>, vector<8x32xf32>
      tpu.vector_store %arg9[%c0, %c0_5], %7 {strides = array<i32>} : memref<8x32xf32, #tpu.memory_space<vmem>>, vector<8x32xf32>,
    } else {
    }
    %c0_i32_1 = arith.constant 0 : i32
    %c2_i32 = arith.constant 2 : i32
    %3 = arith.addi %c0_i32_1, %c2_i32 : i32
    %c1_i32 = arith.constant 1 : i32
    scf.for %arg10 = %c0_i32_1 to %3 step %c1_i32  : i32 {
      %c1_i32_5 = arith.constant 1 : i32
      %7 = arith.muli %arg10, %c1_i32_5 : i32
      %c0_i32_6 = arith.constant 0 : i32
      %8 = arith.addi %c0_i32_6, %7 : i32
      %c0 = arith.constant 0 : index
      %9 = arith.index_cast %8 : i32 to index
      %c0_7 = arith.constant 0 : index
      %c0_8 = arith.constant 0 : index
      %10 = vector.load %arg2[%c0, %9, %c0_7, %c0_8] : memref<1x2x8x8xf32, #tpu.memory_space<vmem>>, vector<1x1x8x8xf32>
      %11 = vector.shape_cast %10 : vector<1x1x8x8xf32> to vector<8x8xf32>
      %c0_9 = arith.constant 0 : index
      %12 = arith.index_cast %8 : i32 to index
      %c0_10 = arith.constant 0 : index
      %c0_11 = arith.constant 0 : index
      %13 = vector.load %arg3[%c0_9, %12, %c0_10, %c0_11] : memref<1x2x8x8xf32, #tpu.memory_space<vmem>>, vector<1x1x8x8xf32>
      %14 = vector.shape_cast %13 : vector<1x1x8x8xf32> to vector<8x8xf32>
      %c0_12 = arith.constant 0 : index
      %15 = arith.index_cast %8 : i32 to index
      %c0_13 = arith.constant 0 : index
      %c0_14 = arith.constant 0 : index
      %16 = vector.load %arg4[%c0_12, %15, %c0_13, %c0_14] : memref<1x2x8x8xf32, #tpu.memory_space<vmem>>, vector<1x1x8x8xf32>
      %17 = vector.shape_cast %16 : vector<1x1x8x8xf32> to vector<8x8xf32>
      %cst = arith.constant dense<0.000000e+00> : vector<8x8xf32>
      %18 = tpu.matmul %11, %14, %cst {dimension_numbers = #tpu.dot_dimension_numbers<[1], [1], [0], [0], [0, 0, 1, 0], [], []>} : vector<8x8xf32>, vector<8x8xf32>, vector<8x8xf32> -> vector<8x8xf32>
      %cst_15 = arith.constant 0.353553385 : f32
      %19 = vector.broadcast %cst_15 : f32 to vector<8x8xf32>
      %20 = arith.mulf %18, %19 : vector<8x8xf32>
      %cst_16 = arith.constant dense<0xFF800000> : vector<8xf32>
      %21 = vector.multi_reduction <maximumf>, %20, %cst_16 [1] : vector<8x8xf32> to vector<8xf32>
      %22 = vector.shape_cast %21 : vector<8xf32> to vector<8x1xf32>
      %23 = vector.broadcast %22 : vector<8x1xf32> to vector<8x8xf32>
      %24 = arith.subf %20, %23 : vector<8x8xf32>
      %25 = math.exp %24 : vector<8x8xf32>
      %cst_17 = arith.constant dense<0.000000e+00> : vector<8xf32>
      %26 = vector.multi_reduction <add>, %25, %cst_17 [1] : vector<8x8xf32> to vector<8xf32>
      %27 = vector.shape_cast %26 : vector<8xf32> to vector<8x1xf32>
      %cst_18 = arith.constant dense<0.000000e+00> : vector<8x8xf32>
      %28 = tpu.matmul %25, %17, %cst_18 {dimension_numbers = #tpu.dot_dimension_numbers<[1], [0], [0], [1], [0, 0, 1, 1], [], []>} : vector<8x8xf32>, vector<8x8xf32>, vector<8x8xf32> -> vector<8x8xf32>
      %29 = tpu.reciprocal %27 {approx = true} : vector<8x1xf32> -> vector<8x1xf32>
      %30 = vector.broadcast %29 : vector<8x1xf32> to vector<8x8xf32>
      %31 = arith.mulf %28, %30 : vector<8x8xf32>
      %c0_19 = arith.constant 0 : index
      %c0_20 = arith.constant 0 : index
      %32 = vector.load %arg9[%c0_19, %c0_20] : memref<8x32xf32, #tpu.memory_space<vmem>>, vector<8x32xf32>
      %33 = arith.index_cast %8 : i32 to index
      %c0_21 = arith.constant 0 : index
      %c0_22 = arith.constant 0 : index
      %34 = vector.load %arg5[%33, %c0_21, %c0_22] : memref<2x8x32xf32, #tpu.memory_space<vmem>>, vector<1x8x32xf32>
      %35 = vector.shape_cast %34 : vector<1x8x32xf32> to vector<8x32xf32>
      %cst_23 = arith.constant dense<0.000000e+00> : vector<8x32xf32>
      %36 = tpu.matmul %31, %35, %cst_23 {dimension_numbers = #tpu.dot_dimension_numbers<[1], [0], [0], [1], [0, 0, 1, 1], [], []>} : vector<8x8xf32>, vector<8x32xf32>, vector<8x32xf32> -> vector<8x32xf32>
      %37 = arith.addf %32, %36 : vector<8x32xf32>
      %c0_24 = arith.constant 0 : index
      %c0_25 = arith.constant 0 : index
      %38 = vector.load %arg9[%c0_24, %c0_25] : memref<8x32xf32, #tpu.memory_space<vmem>>, vector<8x32xf32>
      tpu.vector_store %arg9[%c0_24, %c0_25], %37 {strides = array<i32>} : memref<8x32xf32, #tpu.memory_space<vmem>>, vector<8x32xf32>,
    }
    %c2_i32_2 = arith.constant 2 : i32
    %c1_i32_3 = arith.constant 1 : i32
    %4 = arith.cmpi eq, %arg1, %c1_i32_3 : i32
    %5 = arith.extui %4 : i1 to i32
    %c0_i32_4 = arith.constant 0 : i32
    %6 = arith.cmpi ne, %5, %c0_i32_4 : i32
    scf.if %6 {
      %c0 = arith.constant 0 : index
      %c0_5 = arith.constant 0 : index
      %7 = vector.load %arg9[%c0, %c0_5] : memref<8x32xf32, #tpu.memory_space<vmem>>, vector<8x32xf32>
      %c0_6 = arith.constant 0 : index
      %c0_7 = arith.constant 0 : index
      %8 = vector.load %arg6[%c0_6, %c0_7] : memref<1x32xf32, #tpu.memory_space<vmem>>, vector<1x32xf32>
      %9 = vector.broadcast %8 : vector<1x32xf32> to vector<8x32xf32>
      %10 = arith.addf %7, %9 : vector<8x32xf32>
      %c0_8 = arith.constant 0 : index
      %c0_9 = arith.constant 0 : index
      %c0_10 = arith.constant 0 : index
      %11 = vector.load %arg7[%c0_8, %c0_9, %c0_10] : memref<1x8x32xf32, #tpu.memory_space<vmem>>, vector<1x8x32xf32>
      %12 = vector.shape_cast %11 : vector<1x8x32xf32> to vector<8x32xf32>
      %13 = arith.addf %10, %12 : vector<8x32xf32>
      %c0_11 = arith.constant 0 : index
      %c0_12 = arith.constant 0 : index
      %c0_13 = arith.constant 0 : index
      %14 = vector.load %arg8[%c0_11, %c0_12, %c0_13] : memref<1x8x32xf32, #tpu.memory_space<vmem>>, vector<1x8x32xf32>
      %15 = vector.shape_cast %14 : vector<1x8x32xf32> to vector<8x32xf32>
      %16 = vector.shape_cast %13 : vector<8x32xf32> to vector<1x8x32xf32>
      tpu.vector_store %arg8[%c0_11, %c0_12, %c0_13], %16 {strides = array<i32>} : memref<1x8x32xf32, #tpu.memory_space<vmem>>, vector<1x8x32xf32>,
    } else {
    }
    return
  }
  func.func @transform_0(%arg0: i32, %arg1: i32) -> (i32, i32, i32, i32) {
    %c0_i32 = arith.constant 0 : i32
    %c0_i32_0 = arith.constant 0 : i32
    %c0_i32_1 = arith.constant 0 : i32
    return %arg0, %arg1, %c0_i32, %c0_i32_0 : i32, i32, i32, i32
  }
  func.func @transform_1(%arg0: i32, %arg1: i32) -> (i32, i32, i32, i32) {
    %c0_i32 = arith.constant 0 : i32
    %c0_i32_0 = arith.constant 0 : i32
    %c0_i32_1 = arith.constant 0 : i32
    return %arg0, %arg1, %c0_i32, %c0_i32_0 : i32, i32, i32, i32
  }
  func.func @transform_2(%arg0: i32, %arg1: i32) -> (i32, i32, i32, i32) {
    %c0_i32 = arith.constant 0 : i32
    %c0_i32_0 = arith.constant 0 : i32
    %c0_i32_1 = arith.constant 0 : i32
    return %arg0, %arg1, %c0_i32, %c0_i32_0 : i32, i32, i32, i32
  }
  func.func @transform_3(%arg0: i32, %arg1: i32) -> (i32, i32, i32) {
    %c0_i32 = arith.constant 0 : i32
    %c0_i32_0 = arith.constant 0 : i32
    %c0_i32_1 = arith.constant 0 : i32
    return %arg1, %c0_i32, %c0_i32_0 : i32, i32, i32
  }
  func.func @transform_4(%arg0: i32, %arg1: i32) -> (i32, i32) {
    %c0_i32 = arith.constant 0 : i32
    %c0_i32_0 = arith.constant 0 : i32
    %c0_i32_1 = arith.constant 0 : i32
    return %c0_i32, %c0_i32_0 : i32, i32
  }
  func.func @transform_5(%arg0: i32, %arg1: i32) -> (i32, i32, i32) {
    %c0_i32 = arith.constant 0 : i32
    %c0_i32_0 = arith.constant 0 : i32
    %c0_i32_1 = arith.constant 0 : i32
    return %arg0, %c0_i32, %c0_i32_0 : i32, i32, i32
  }
  func.func @transform_6(%arg0: i32, %arg1: i32) -> (i32, i32, i32) {
    %c0_i32 = arith.constant 0 : i32
    %c0_i32_0 = arith.constant 0 : i32
    %c0_i32_1 = arith.constant 0 : i32
    return %arg0, %c0_i32, %c0_i32_0 : i32, i32, i32
  }
}

module attributes {stable_mosaic.version = 11 : i64} {
  func.func @_ln2_mlp_residual_kernel(%arg0: i32, %arg1: i32, %arg2: memref<16x32xf32, #tpu.memory_space<vmem>>, %arg3: memref<1x32xf32, #tpu.memory_space<vmem>>, %arg4: memref<1x32xf32, #tpu.memory_space<vmem>>, %arg5: memref<32x256xf32, #tpu.memory_space<vmem>>, %arg6: memref<1x256xf32, #tpu.memory_space<vmem>>, %arg7: memref<256x32xf32, #tpu.memory_space<vmem>>, %arg8: memref<1x32xf32, #tpu.memory_space<vmem>>, %arg9: memref<16x32xf32, #tpu.memory_space<vmem>>, %arg10: memref<16x32xf32, #tpu.memory_space<vmem>>, %arg11: memref<16x32xf32, #tpu.memory_space<vmem>>) attributes {dimension_semantics = [#tpu.dimension_semantics<parallel>, #tpu.dimension_semantics<arbitrary>], iteration_bounds = array<i64: 1, 2>, scalar_prefetch = 0 : i64, scratch_operands = 2 : i64, tpu.core_type = #tpu.core_type<tc>, window_params = [{transform_indices = @transform_0, window_bounds = array<i64: 16, 32>}, {pipeline_mode = #tpu.pipeline_mode<synchronous>, transform_indices = @transform_1, window_bounds = array<i64: 1, 32>}, {pipeline_mode = #tpu.pipeline_mode<synchronous>, transform_indices = @transform_2, window_bounds = array<i64: 1, 32>}, {transform_indices = @transform_3, window_bounds = array<i64: 32, 256>}, {transform_indices = @transform_4, window_bounds = array<i64: 1, 256>}, {transform_indices = @transform_5, window_bounds = array<i64: 256, 32>}, {pipeline_mode = #tpu.pipeline_mode<synchronous>, transform_indices = @transform_6, window_bounds = array<i64: 1, 32>}, {transform_indices = @transform_7, window_bounds = array<i64: 16, 32>}]} {
    %c0_i32 = arith.constant 0 : i32
    %0 = arith.cmpi eq, %arg1, %c0_i32 : i32
    %1 = arith.extui %0 : i1 to i32
    %c0_i32_0 = arith.constant 0 : i32
    %2 = arith.cmpi ne, %1, %c0_i32_0 : i32
    scf.if %2 {
      %c0_18 = arith.constant 0 : index
      %c0_19 = arith.constant 0 : index
      %30 = vector.load %arg2[%c0_18, %c0_19] : memref<16x32xf32, #tpu.memory_space<vmem>>, vector<16x32xf32>
      %c0_20 = arith.constant 0 : index
      %c0_21 = arith.constant 0 : index
      %31 = vector.load %arg3[%c0_20, %c0_21] : memref<1x32xf32, #tpu.memory_space<vmem>>, vector<1x32xf32>
      %c0_22 = arith.constant 0 : index
      %c0_23 = arith.constant 0 : index
      %32 = vector.load %arg4[%c0_22, %c0_23] : memref<1x32xf32, #tpu.memory_space<vmem>>, vector<1x32xf32>
      %cst_24 = arith.constant dense<0.000000e+00> : vector<16xf32>
      %33 = vector.multi_reduction <add>, %30, %cst_24 [1] : vector<16x32xf32> to vector<16xf32>
      %34 = vector.shape_cast %33 : vector<16xf32> to vector<16x1xf32>
      %cst_25 = arith.constant 3.200000e+01 : f32
      %35 = vector.broadcast %cst_25 : f32 to vector<16x1xf32>
      %36 = arith.divf %34, %35 : vector<16x1xf32>
      %37 = vector.broadcast %36 : vector<16x1xf32> to vector<16x32xf32>
      %38 = arith.subf %30, %37 : vector<16x32xf32>
      %39 = arith.mulf %38, %38 : vector<16x32xf32>
      %cst_26 = arith.constant dense<0.000000e+00> : vector<16xf32>
      %40 = vector.multi_reduction <add>, %39, %cst_26 [1] : vector<16x32xf32> to vector<16xf32>
      %41 = vector.shape_cast %40 : vector<16xf32> to vector<16x1xf32>
      %cst_27 = arith.constant 3.200000e+01 : f32
      %42 = vector.broadcast %cst_27 : f32 to vector<16x1xf32>
      %43 = arith.divf %41, %42 : vector<16x1xf32>
      %44 = vector.broadcast %36 : vector<16x1xf32> to vector<16x32xf32>
      %45 = arith.subf %30, %44 : vector<16x32xf32>
      %cst_28 = arith.constant 9.99999997E-7 : f32
      %46 = vector.broadcast %cst_28 : f32 to vector<16x1xf32>
      %47 = arith.addf %43, %46 : vector<16x1xf32>
      %48 = math.rsqrt %47 : vector<16x1xf32>
      %49 = vector.broadcast %48 : vector<16x1xf32> to vector<16x32xf32>
      %50 = arith.mulf %45, %49 : vector<16x32xf32>
      %51 = vector.broadcast %31 : vector<1x32xf32> to vector<16x32xf32>
      %52 = arith.mulf %50, %51 : vector<16x32xf32>
      %53 = vector.broadcast %32 : vector<1x32xf32> to vector<16x32xf32>
      %54 = arith.addf %52, %53 : vector<16x32xf32>
      %c0_29 = arith.constant 0 : index
      %c0_30 = arith.constant 0 : index
      %55 = vector.load %arg10[%c0_29, %c0_30] : memref<16x32xf32, #tpu.memory_space<vmem>>, vector<16x32xf32>
      tpu.vector_store %arg10[%c0_29, %c0_30], %54 {strides = array<i32>} : memref<16x32xf32, #tpu.memory_space<vmem>>, vector<16x32xf32>,
      %cst_31 = arith.constant 0.000000e+00 : f32
      %56 = vector.broadcast %cst_31 : f32 to vector<16x32xf32>
      %c0_32 = arith.constant 0 : index
      %c0_33 = arith.constant 0 : index
      %57 = vector.load %arg11[%c0_32, %c0_33] : memref<16x32xf32, #tpu.memory_space<vmem>>, vector<16x32xf32>
      tpu.vector_store %arg11[%c0_32, %c0_33], %56 {strides = array<i32>} : memref<16x32xf32, #tpu.memory_space<vmem>>, vector<16x32xf32>,
    } else {
    }
    %c0 = arith.constant 0 : index
    %c0_1 = arith.constant 0 : index
    %3 = vector.load %arg10[%c0, %c0_1] : memref<16x32xf32, #tpu.memory_space<vmem>>, vector<16x32xf32>
    %c0_2 = arith.constant 0 : index
    %c0_3 = arith.constant 0 : index
    %4 = vector.load %arg5[%c0_2, %c0_3] : memref<32x256xf32, #tpu.memory_space<vmem>>, vector<32x256xf32>
    %cst = arith.constant dense<0.000000e+00> : vector<16x256xf32>
    %5 = tpu.matmul %3, %4, %cst {dimension_numbers = #tpu.dot_dimension_numbers<[1], [0], [0], [1], [0, 0, 1, 1], [], []>} : vector<16x32xf32>, vector<32x256xf32>, vector<16x256xf32> -> vector<16x256xf32>
    %c0_4 = arith.constant 0 : index
    %c0_5 = arith.constant 0 : index
    %6 = vector.load %arg6[%c0_4, %c0_5] : memref<1x256xf32, #tpu.memory_space<vmem>>, vector<1x256xf32>
    %7 = vector.broadcast %6 : vector<1x256xf32> to vector<16x256xf32>
    %8 = arith.addf %5, %7 : vector<16x256xf32>
    %cst_6 = arith.constant 5.000000e-01 : f32
    %9 = vector.broadcast %cst_6 : f32 to vector<16x256xf32>
    %10 = arith.mulf %9, %8 : vector<16x256xf32>
    %cst_7 = arith.constant 4.471500e-02 : f32
    %11 = vector.broadcast %cst_7 : f32 to vector<16x256xf32>
    %12 = arith.mulf %11, %8 : vector<16x256xf32>
    %13 = arith.mulf %12, %8 : vector<16x256xf32>
    %14 = arith.mulf %13, %8 : vector<16x256xf32>
    %15 = arith.addf %8, %14 : vector<16x256xf32>
    %cst_8 = arith.constant 0.797884583 : f32
    %16 = vector.broadcast %cst_8 : f32 to vector<16x256xf32>
    %17 = arith.mulf %16, %15 : vector<16x256xf32>
    %18 = math.tanh %17 : vector<16x256xf32>
    %cst_9 = arith.constant 1.000000e+00 : f32
    %19 = vector.broadcast %cst_9 : f32 to vector<16x256xf32>
    %20 = arith.addf %19, %18 : vector<16x256xf32>
    %21 = arith.mulf %10, %20 : vector<16x256xf32>
    %c0_10 = arith.constant 0 : index
    %c0_11 = arith.constant 0 : index
    %22 = vector.load %arg11[%c0_10, %c0_11] : memref<16x32xf32, #tpu.memory_space<vmem>>, vector<16x32xf32>
    %c0_12 = arith.constant 0 : index
    %c0_13 = arith.constant 0 : index
    %23 = vector.load %arg7[%c0_12, %c0_13] : memref<256x32xf32, #tpu.memory_space<vmem>>, vector<256x32xf32>
    %cst_14 = arith.constant dense<0.000000e+00> : vector<16x32xf32>
    %24 = tpu.matmul %21, %23, %cst_14 {dimension_numbers = #tpu.dot_dimension_numbers<[1], [0], [0], [1], [0, 0, 1, 1], [], []>} : vector<16x256xf32>, vector<256x32xf32>, vector<16x32xf32> -> vector<16x32xf32>
    %25 = arith.addf %22, %24 : vector<16x32xf32>
    %c0_15 = arith.constant 0 : index
    %c0_16 = arith.constant 0 : index
    %26 = vector.load %arg11[%c0_15, %c0_16] : memref<16x32xf32, #tpu.memory_space<vmem>>, vector<16x32xf32>
    tpu.vector_store %arg11[%c0_15, %c0_16], %25 {strides = array<i32>} : memref<16x32xf32, #tpu.memory_space<vmem>>, vector<16x32xf32>,
    %c1_i32 = arith.constant 1 : i32
    %27 = arith.cmpi eq, %arg1, %c1_i32 : i32
    %28 = arith.extui %27 : i1 to i32
    %c0_i32_17 = arith.constant 0 : i32
    %29 = arith.cmpi ne, %28, %c0_i32_17 : i32
    scf.if %29 {
      %c0_18 = arith.constant 0 : index
      %c0_19 = arith.constant 0 : index
      %30 = vector.load %arg11[%c0_18, %c0_19] : memref<16x32xf32, #tpu.memory_space<vmem>>, vector<16x32xf32>
      %c0_20 = arith.constant 0 : index
      %c0_21 = arith.constant 0 : index
      %31 = vector.load %arg8[%c0_20, %c0_21] : memref<1x32xf32, #tpu.memory_space<vmem>>, vector<1x32xf32>
      %32 = vector.broadcast %31 : vector<1x32xf32> to vector<16x32xf32>
      %33 = arith.addf %30, %32 : vector<16x32xf32>
      %c0_22 = arith.constant 0 : index
      %c0_23 = arith.constant 0 : index
      %34 = vector.load %arg2[%c0_22, %c0_23] : memref<16x32xf32, #tpu.memory_space<vmem>>, vector<16x32xf32>
      %35 = arith.addf %33, %34 : vector<16x32xf32>
      %c0_24 = arith.constant 0 : index
      %c0_25 = arith.constant 0 : index
      %36 = vector.load %arg9[%c0_24, %c0_25] : memref<16x32xf32, #tpu.memory_space<vmem>>, vector<16x32xf32>
      tpu.vector_store %arg9[%c0_24, %c0_25], %35 {strides = array<i32>} : memref<16x32xf32, #tpu.memory_space<vmem>>, vector<16x32xf32>,
    } else {
    }
    return
  }
  func.func @transform_0(%arg0: i32, %arg1: i32) -> (i32, i32) {
    %c0_i32 = arith.constant 0 : i32
    %c0_i32_0 = arith.constant 0 : i32
    return %arg0, %c0_i32 : i32, i32
  }
  func.func @transform_1(%arg0: i32, %arg1: i32) -> (i32, i32) {
    %c0_i32 = arith.constant 0 : i32
    %c0_i32_0 = arith.constant 0 : i32
    %c0_i32_1 = arith.constant 0 : i32
    return %c0_i32, %c0_i32_0 : i32, i32
  }
  func.func @transform_2(%arg0: i32, %arg1: i32) -> (i32, i32) {
    %c0_i32 = arith.constant 0 : i32
    %c0_i32_0 = arith.constant 0 : i32
    %c0_i32_1 = arith.constant 0 : i32
    return %c0_i32, %c0_i32_0 : i32, i32
  }
  func.func @transform_3(%arg0: i32, %arg1: i32) -> (i32, i32) {
    %c0_i32 = arith.constant 0 : i32
    %c0_i32_0 = arith.constant 0 : i32
    return %c0_i32, %arg1 : i32, i32
  }
  func.func @transform_4(%arg0: i32, %arg1: i32) -> (i32, i32) {
    %c0_i32 = arith.constant 0 : i32
    %c0_i32_0 = arith.constant 0 : i32
    return %c0_i32, %arg1 : i32, i32
  }
  func.func @transform_5(%arg0: i32, %arg1: i32) -> (i32, i32) {
    %c0_i32 = arith.constant 0 : i32
    %c0_i32_0 = arith.constant 0 : i32
    return %arg1, %c0_i32 : i32, i32
  }
  func.func @transform_6(%arg0: i32, %arg1: i32) -> (i32, i32) {
    %c0_i32 = arith.constant 0 : i32
    %c0_i32_0 = arith.constant 0 : i32
    %c0_i32_1 = arith.constant 0 : i32
    return %c0_i32, %c0_i32_0 : i32, i32
  }
  func.func @transform_7(%arg0: i32, %arg1: i32) -> (i32, i32) {
    %c0_i32 = arith.constant 0 : i32
    %c0_i32_0 = arith.constant 0 : i32
    return %arg0, %c0_i32 : i32, i32
  }
}

</mosaic_0001>

<bundles_post_ra>
// kernel: siglip_encoder_layer.3
= control target key start
LH: loop header
LB: loop body
LE: loop exit
PB: predicated region body
PF: predicated region fallthrough
CT: control target
= control target key end

     0   :  { %vm24_vm0 = vcmask 261120   ;;  %v146_v4 = vmov 32.0   ;;  %vm123_vm8 = vcmask 785408   ;;  %s216_s0 = inlined_call_operand.vmem [shape: f32[16,32], index: 0, kind: input, shape index: {}]   ;;  %s217_s1 = inlined_call_operand.vmem [shape: f32[1,32], index: 1, kind: input, shape index: {}]   ;;  %s218_s2 = inlined_call_operand.vmem [shape: f32[1,32], index: 2, kind: input, shape index: {}]   ;;  %s219_s4 = inlined_call_operand.vmem [shape: f32[1,96], index: 4, kind: input, shape index: {}]   ;;  %s220_s3 = inlined_call_operand.vmem [shape: f32[32,96], index: 3, kind: input, shape index: {}]   ;;  %s221_s5 = inlined_call_operand.vmem [shape: f32[16,96], index: 5, kind: output, shape index: {}]  }
   0x1   :  { %v20_v0 = vld [vmem:[%s216_s0] sm:$0xff]  ;;  %v21_v2 = vld [vmem:[%s216_s0 + $0x8] sm:$0xff]  ;;  %140 = vrcp.f32 %v146_v4  ;;  %v89_v21 = vld [vmem:[%s220_s3 + $0x18] sm:$0xff] }
   0x2   :  { %v25_v1 = vsel %vm24_vm0, %v20_v0, 0.0  ;;  %v28_v3 = vsel %vm24_vm0, %v21_v2, 0.0  ;;  %112 = vmatpush.msra.mxu0 %v89_v21  ;;  %132 = vmatpush.msra.mxu1 %v89_v21  ;;  %v88_v22 = vld [vmem:[%s220_s3 + $0x10] sm:$0xff]  ;;  %v87_v23 = vld [vmem:[%s220_s3 + $0x8] sm:$0xff]  ;;  %v86_v24 = vld [vmem:[%s220_s3] sm:$0xff] }
   0x3   :  { %26 = vadd.xlane.f32.xlu0 %v25_v1  ;;  %v137_v39 = vld [vmem:[%s217_s1] ss:$0 sm:$0xff] }
   0x4   :  { %113 = vmatpush.msra.mxu0 %v88_v22  ;;  %133 = vmatpush.msra.mxu1 %v88_v22  ;;  %v138_v43 = vld [vmem:[%s218_s2] ss:$0 sm:$0xff] }
   0x5   :  { %v139_v53 = vld [vmem:[%s219_s4] ss:$0 sm:$0xff] }
   0x6   :  { %114 = vmatpush.msra.mxu0 %v87_v23  ;;  %134 = vmatpush.msra.mxu1 %v87_v23 }
   0x7   :  { %v141_v5 = vpop.eup %140 }
   0x8   :  { %v32_v6 = vmul.f32 32.0, %v141_v5  ;;  %vm36_vm1 = vweird.f32 %v141_v5  ;;  %115 = vmatpush.msra.mxu0 %v86_v24  ;;  %135 = vmatpush.msra.mxu1 %v86_v24 }
   0xa   :  { %v33_v7 = vsub.f32 1.0, %v32_v6 }
   0xb   :  { %29 = vadd.xlane.f32.xlu0 %v28_v3 }
   0xc   :  { %v34_v8 = vmul.f32 %v141_v5, %v33_v7 }
   0xe   :  { %v35_v9 = vadd.f32 %v141_v5, %v34_v8 }
  0x10   :  { %v37_v10 = vsel %vm36_vm1, %v141_v5, %v35_v9 }
  0x76   :  { %v27_v11 = vpop.xlane.xlu0 %26 }
  0x77   :  { %v38_v12 = vmul.f32 %v37_v10, %v27_v11 }
  0x79   :  { %v40_v13 = vsub.f32 %v20_v0, %v38_v12 }
  0x7b   :  { %v42_v14 = vmul.f32 %v40_v13, %v40_v13 }
  0x7d   :  { %v44_v15 = vsel %vm24_vm0, %v42_v14, 0.0 }
  0x7e   :  { %45 = vadd.xlane.f32.xlu1 %v44_v15  ;;  %v30_v16 = vpop.xlane.xlu0 %29 }
  0x7f   :  { %v39_v17 = vmul.f32 %v37_v10, %v30_v16 }
  0x81   :  { %v41_v18 = vsub.f32 %v21_v2, %v39_v17 }
  0x83   :  { %v43_v19 = vmul.f32 %v41_v18, %v41_v18 }
  0x85   :  { %v47_v20 = vsel %vm24_vm0, %v43_v19, 0.0 }
  0x86   :  { %48 = vadd.xlane.f32.xlu1 %v47_v20 }
  0xf1   :  { %v46_v25 = vpop.xlane.xlu1 %45 }
  0xf2   :  { %v50_v26 = vmul.f32 %v46_v25, %v37_v10 }
  0xf4   :  { %v52_v27 = vadd.f32 1e-06, %v50_v26 }
  0xf6   :  { %142 = vrsqrt.f32 %v52_v27  ;;  %vm60_vm3 = vweird.f32 %v52_v27 }
  0xf9   :  { %v49_v28 = vpop.xlane.xlu1 %48 }
  0xfa   :  { %v51_v29 = vmul.f32 %v49_v28, %v37_v10 }
  0xfc   :  { %v143_v30 = vpop.eup %142  ;;  %v53_v31 = vadd.f32 1e-06, %v51_v29 }
  0xfd   :  { %v55_v32 = vmul.f32 %v143_v30, %v52_v27  ;;  %vm61_vm2 = vweird.f32 %v143_v30 }
  0xfe   :  { %144 = vrsqrt.f32 %v53_v31  ;;  %vm62_vm4 = vmor %vm60_vm3, %vm61_vm2  ;;  %vm70_vm6 = vweird.f32 %v53_v31 }
  0xff   :  { %v56_v33 = vmul.f32 %v143_v30, %v55_v32 }
 0x101   :  { %v57_v34 = vmul.f32 0.5, %v56_v33 }
 0x103   :  { %v58_v35 = vsub.f32 1.5, %v57_v34 }
 0x104   :  { %v145_v36 = vpop.eup %144 }
 0x105   :  { %v59_v37 = vmul.f32 %v143_v30, %v58_v35  ;;  %v65_v38 = vmul.f32 %v145_v36, %v53_v31  ;;  %vm71_vm5 = vweird.f32 %v145_v36 }
 0x106   :  { %vm72_vm7 = vmor %vm70_vm6, %vm71_vm5 }
 0x107   :  { %v63_v40 = vsel %vm62_vm4, %v143_v30, %v59_v37  ;;  %v66_v41 = vmul.f32 %v145_v36, %v65_v38 }
 0x108   :  { %v74_v42 = vmul.f32 %v63_v40, %v40_v13 }
 0x109   :  { %v67_v44 = vmul.f32 0.5, %v66_v41 }
 0x10a   :  { %v79_v45 = vmul.f32 %v137_v39, %v74_v42 }
 0x10b   :  { %v68_v46 = vsub.f32 1.5, %v67_v44 }
 0x10c   :  { %v84_v47 = vadd.f32 %v138_v43, %v79_v45 }
 0x10d   :  { %v69_v48 = vmul.f32 %v145_v36, %v68_v46 }
 0x10e   :  { %130 = vmatmul.msk.f32.vlgmr.msra.gmra.mxu0 %vm24_vm0, %v84_v47 }
 0x10f   :  { %v73_v49 = vsel %vm72_vm7, %v145_v36, %v69_v48 }
 0x110   :  { %v75_v50 = vmul.f32 %v73_v49, %v41_v18 }
 0x112   :  { %v80_v51 = vmul.f32 %v137_v39, %v75_v50 }
 0x114   :  { %v85_v52 = vadd.f32 %v138_v43, %v80_v51 }
 0x116   :  { %131 = vmatmul.msk.f32.vlgmr.msra.gmra.mxu1 %vm24_vm0, %v85_v52 }
 0x18b   :  { %v117_v54 = vpop.f32.mrf.mxu0 }
 0x18c   :  { %v118_v55 = vadd.f32 %v139_v53, %v117_v54 }
 0x18e   :  { %124 = vst.msk [vmem:[%s221_s5] sm:$0xff] %vm123_vm8, %v118_v55 }
 0x193   :  { %v120_v56 = vpop.f32.mrf.mxu1 }
 0x194   :  { %v121_v57 = vadd.f32 %v139_v53, %v120_v56 }
 0x196   :  { %125 = vst.msk [vmem:[%s221_s5 + $0x8] sm:$0xff] %vm123_vm8, %v121_v57 }

// kernel: siglip_encoder_layer.4
= control target key start
LH: loop header
LB: loop body
LE: loop exit
PB: predicated region body
PF: predicated region fallthrough
CT: control target
= control target key end

     0   :  { %s821_s21 = smov 0   ;;  %s823_s22 = smov 0   ;;  %s936_s0 = inlined_call_operand.vmem [shape: f32[2,4,8,8], index: 0, kind: input, shape index: {}]   ;;  %s937_s1 = inlined_call_operand.vmem [shape: f32[2,4,8,8], index: 1, kind: input, shape index: {}]   ;;  %s938_s2 = inlined_call_operand.vmem [shape: f32[2,4,8,8], index: 2, kind: input, shape index: {}]   ;;  %s939_s3 = inlined_call_operand.vmem [shape: f32[4,8,32], index: 3, kind: input, shape index: {}]   ;;  %s940_s4 = inlined_call_operand.vmem [shape: f32[1,32], index: 4, kind: input, shape index: {}]   ;;  %s941_s5 = inlined_call_operand.vmem [shape: f32[2,8,32], index: 5, kind: input, shape index: {}]   ;;  %s942_s6 = inlined_call_operand.vmem [shape: f32[2,8,32], index: 6, kind: output, shape index: {}]  }
   0x1   :  { %s825_s23 = smov 0   ;;  %s827_s24 = smov 0  }
   0x2   :  { %s829_s25 = smov 0  }
   0x3 LB: > { %s25_s26 = sadd.s32 1, %s771_s23  ;;  %s28_s27 = sadd.s32 1, %s775_s24  ;;  %s779_s25 = sphi %s829_s25, %s16_s25   ;;  %s775_s24 = sphi %s827_s24, %s946_s24   ;;  %s771_s23 = sphi %s825_s23, %s945_s23   ;;  %s767_s22 = sphi %s823_s22, %s944_s22   ;;  %s763_s21 = sphi %s821_s21, %s943_s21  }
   0x4   : > { %p26_p0 = scmp.ge.s32.totalorder %s25_s26, 2  ;;  %p660_p1 = scmp.ge.s32.totalorder %s779_s25, 1 }
   0x5   : > { %p285_p2 = scmp.lt.s32.totalorder %s779_s25, 5 }
   0x6   : > { %s948_s26 = smov (%p26_p0, %s25_s26), 0  ;;  %s950_s27 = smov (!%p26_p0, %s28_s27), %s775_s24 }
   0x7   : > { %p286_p3 = pnand %p660_p1, %p285_p2  ;;  %p30_p4 = scmp.ge.s32.totalorder %s950_s27, 2 }
   0x8   : > { %s661_s28 = sshll.u32 (!%p286_p3), %s763_s21, 1  ;;  %p346_p5 = scmp.lt.s32.totalorder (!%p286_p3), %s767_s22, 1 }
   0x9   : > { %s952_s27 = smov (%p30_p4, %s950_s27), 0  ;;  %289 = sbr.rel (%p286_p3) target bundleno = 565 (0x235), region = 44 }
   0xa   : > { %p348_p6 = scmp.lt.s32.totalorder (!%p286_p3), %s661_s28, 3  ;;  %p674_p7 = scmp.ne.s32.totalorder (!%p286_p3), %s763_s21, 0 }
   0xe   : > { %s954_s22 = smov (!%p346_p5, %s767_s22), 1  ;;  %s956_s28 = smov (!%p348_p6, %s661_s28), 3 }
   0xf   : > { %s662_s29 = sshll.u32 %s954_s22, 2  ;;  %s672_s30 = sshll.u32 %s954_s22, 3 }
  0x10   : > { %s351_s7 = sadd.s32 %s662_s29, %s956_s28  ;;  %s671_s8 = sshll.u32 %s956_s28, 3 }
  0x11   : > { %s854_s9 = sshll.u32 %s351_s7, 3  ;;  %s859_s12 = scalar_lea.vmem %s939_s3, %s671_s8 }
  0x12   : > { %s353_s15 = scalar_lea.vmem %s936_s0, %s854_s9  ;;  %s363_s18 = scalar_lea.vmem %s937_s1, %s854_s9 }
  0x13   : > { %s373_s22 = scalar_lea.vmem %s938_s2, %s854_s9  ;;  %s876_s7 = scalar_lea.vmem %s941_s5, %s672_s30 }
  0x14   : > { %s881_s11 = scalar_lea.vmem %s942_s6, %s672_s30  ;;  %392 = sbr.rel (%p674_p7) target bundleno = 27 (0x1b), region = 48 }
  0x19   : > { %vm393_vm0 = vcmask 261120   ;;  %v785_v0 = vmov 0.0  }
  0x1a   : > { %394 = vst.msk [vmem:[#allocation2] sm:$0xff] %vm393_vm0, %v785_v0 }
  0x1b PF: > { %s884_s13 = smov 0  }
  0x1c LB: >> { %s675_s30 = sshll.u32 %s783_s13, 3  ;;  %vm408_vm1 = vcmask 64512   ;;  %vm497_vm2 = vcmask 261120   ;;  %s400_s13 = sadd.s32 1, %s783_s13   ;;  %s783_s13 = sphi %s884_s13, %s400_s13  }
  0x1d   : >> { %s404_s17 = scalar_lea.vmem %s363_s18, %s675_s30  ;;  %s402_s28 = scalar_lea.vmem %s353_s15, %s675_s30 }
  0x1e   : >> { %v405_v1 = vld [vmem:[%s404_s17] sm:$0xff]  ;;  %s406_s8 = scalar_lea.vmem %s373_s22, %s675_s30  ;;  %s471_s14 = scalar_lea.vmem %s859_s12, %s675_s30 }
  0x1f   : >> { %676 = vmatpush.xpose.msk.msra.mxu0 %vm408_vm1, %v405_v1  ;;  %v403_v2 = vld [vmem:[%s402_s28] sm:$0xff]  ;;  %p397_p8 = scmp.ge.s32.totalorder %s400_s13, 2  }
  0x20   : >> { %v407_v6 = vld [vmem:[%s406_s8] sm:$0xff]  ;;  %p680_p9 = scmp.ne.s32.totalorder (%p397_p8), %s763_s21, 1 }
  0x21   : >> { %463 = vmatpush.msra.mxu1 %v407_v6  ;;  %v472_v12 = vld [vmem:[%s471_s14] sm:$0xff] }
  0x22   : >> { %677 = vmatmul.msk.f32.vlgmr.msra.gmra.mxu0 %vm408_vm1, %v403_v2  ;;  %491 = vmatpush.msra.mxu2 %v472_v12  ;;  %v470_v17 = vld [vmem:[#allocation2] sm:$0xff] }
  0x9f   : >> { %v432_v3 = vpop.f32.mrf.mxu0 }
  0xa0   : >> { %v435_v4 = vmul.f32 0.35355338, %v432_v3 }
  0xa2   : >> { %v436_v5 = vsel %vm408_vm1, %v435_v4, -inf }
  0xa3   : >> { %437 = vmax.xlane.f32.xlu0 %v436_v5 }
 0x116   : >> { %v438_v7 = vpop.xlane.xlu0 %437 }
 0x117   : >> { %v439_v8 = vsub.f32 %v435_v4, %v438_v7 }
 0x119   : >> { %v440_v9 = vmul.f32 1.442695, %v439_v8 }
 0x11b   : >> { %732 = vpow2.f32 %v440_v9 }
 0x121   : >> { %v733_v10 = vpop.eup %732 }
 0x122   : >> { %678 = vmatmul.msk.f32.vlgmr.msra.gmra.mxu1 %vm408_vm1, %v733_v10  ;;  %v442_v11 = vsel %vm408_vm1, %v733_v10, 0.0 }
 0x123   : >> { %443 = vadd.xlane.f32.xlu0 %v442_v11 }
 0x196   : >> { %v444_v13 = vpop.xlane.xlu0 %443 }
 0x197   : >> { %734 = vrcp.f32 %v444_v13 }
 0x19d   : >> { %v735_v14 = vpop.eup %734 }
 0x19f   : >> { %v465_v15 = vpop.f32.mrf.mxu1 }
 0x1a0   : >> { %v469_v16 = vmul.f32 %v735_v14, %v465_v15 }
 0x1a2   : >> { %679 = vmatmul.msk.f32.vlgmr.msra.gmra.mxu2 %vm408_vm1, %v469_v16 }
 0x224   : > { %399 = sbr.rel (!%p397_p8) target bundleno = 28 (0x1c), region = 105 }
 0x225   : >> { %v493_v18 = vpop.f32.mrf.mxu2 }
 0x226   : >> { %v496_v19 = vadd.f32 %v493_v18, %v470_v17 }
 0x228   : >> { %498 = vst.msk [vmem:[#allocation2] sm:$0xff] %vm497_vm2, %v496_v19 }
 0x229   : > { %502 = sbr.rel (%p680_p9) target bundleno = 565 (0x235), region = 59 }
 0x22e   : > { %v736_v21 = vld [vmem:[%s940_s4] ss:$0 sm:$0xff] }
 0x22f   : > { %v503_v20 = vld [vmem:[#allocation2] sm:$0xff] }
 0x230   : > { %v509_v22 = vld [vmem:[%s876_s7] sm:$0xff]  ;;  %v508_v23 = vadd.f32 %v736_v21, %v503_v20 }
 0x232   : > { %v510_v24 = vadd.f32 %v509_v22, %v508_v23 }
 0x234   : > { %512 = vst.msk [vmem:[%s881_s11] sm:$0xff] %vm497_vm2, %v510_v24 }
 0x235 PF: > { %s16_s25 = sadd.s32 1, %s779_s25   ;;  %s943_s21 = smov %s771_s23 }
 0x236   : > { %p13_p10 = scmp.ge.s32.totalorder %s16_s25, 6   ;;  %s944_s22 = smov %s775_s24 }
 0x237   : > { %s945_s23 = smov %s948_s26  ;;  %s946_s24 = smov %s952_s27 }
 0x238   :  { %15 = sbr.rel (!%p13_p10) target bundleno = 3 (0x3), region = 116 }

// kernel: siglip_encoder_layer.5
= control target key start
LH: loop header
LB: loop body
LE: loop exit
PB: predicated region body
PF: predicated region fallthrough
CT: control target
= control target key end

     0   :  { %12 = vsyncpa [#allocation6], 0  ;;  %s976_s24 = smov 0   ;;  %s978_s25 = smov 0   ;;  %s1142_s0 = inlined_call_operand.vmem [shape: f32[16,32], index: 0, kind: input, shape index: {}]   ;;  %s1143_s1 = inlined_call_operand.vmem [shape: f32[1,32], index: 1, kind: input, shape index: {}]   ;;  %s1144_s2 = inlined_call_operand.vmem [shape: f32[1,32], index: 2, kind: input, shape index: {}]   ;;  %s1145_s3 = inlined_call_operand.vmem [shape: f32[32,512], index: 3, kind: input, shape index: {}]   ;;  %s1146_s4 = inlined_call_operand.vmem [shape: f32[1,512], index: 4, kind: input, shape index: {}]   ;;  %s1147_s5 = inlined_call_operand.vmem [shape: f32[512,32], index: 5, kind: input, shape index: {}]   ;;  %s1148_s6 = inlined_call_operand.vmem [shape: f32[1,32], index: 6, kind: input, shape index: {}]   ;;  %s1149_s7 = inlined_call_operand.hbm [shape: f32[16,32], index: 7, kind: output, shape index: {}]  }
   0x1   :  { %s980_s26 = smov 0   ;;  %s982_s27 = smov 0  }
   0x2   :  { %s984_s28 = smov 0  }
   0x3 LB: > { %s768_s29 = sadd.s32 4294967295, %s929_s28   ;;  %s27_s30 = sadd.s32 1, %s925_s27  ;;  %s929_s28 = sphi %s984_s28, %s18_s28   ;;  %s925_s27 = sphi %s982_s27, %s1153_s27   ;;  %s921_s26 = sphi %s980_s26, %s1152_s26   ;;  %s917_s25 = sphi %s978_s25, %s1151_s25   ;;  %s913_s24 = sphi %s976_s24, %s1150_s24  }
   0x4   : > { %p28_p0 = scmp.ge.s32.totalorder %s27_s30, 2  ;;  %p112_p1 = scmp.ne.s32.totalorder %s917_s25, %s913_s24 }
   0x5   : > { %p113_p2 = scmp.eq.s32.totalorder %s929_s28, 0  ;;  %s105_s9 = sadd.s32 1, %s917_s25 }
   0x6   : > { %s1155_s30 = smov (%p28_p0, %s27_s30), 0  ;;  %p771_p5 = scmp.ge.s32.totalorder %s929_s28, 2 }
   0x7   : > { %p114_p3 = por %p113_p2, %p112_p1  ;;  %s102_s8 = ssub.s32 %s925_s27, %s1155_s30 }
   0x8   : > { %p103_p4 = scmp.eq.s32.totalorder %s102_s8, 0  ;;  %255 = sbr.rel (%p771_p5) target bundleno = 25 (0x19), region = 32 }
   0xa   : > { %s1012_s10 = scalar_select %p103_p4, %s917_s25, %s105_s9  }
   0xd   : > { %258 = sbr.rel (!%p114_p3) target bundleno = 25 (0x19), region = 36  ;;  %s260_s11 = sand.u32 (%p114_p3), 1, %s917_s25  }
   0xe   : > { %s790_s12 = sshll.u32 (%p114_p3), %s925_s27, 4  ;;  %s772_s13 = sshll.u32 (%p114_p3), %s260_s11, 6 }
   0xf   : > { %s265_s16 = scalar_lea.vmem (%p114_p3), %s1145_s3, %s790_s12  ;;  %s262_s17 = scalar_lea.vmem (%p114_p3), [#allocation4], %s772_s13 }
  0x10   : > { %v278_v0 = vld [vmem:[%s265_s16] sm:$0xff] (%p114_p3)  ;;  %v280_v1 = vld [vmem:[%s265_s16 + $0x8] sm:$0xff] (%p114_p3) }
  0x11   : > { %v282_v2 = vld [vmem:[%s265_s16 + $0x20] sm:$0xff] (%p114_p3)  ;;  %279 = vst [vmem:[%s262_s17] sm:$0xff] (%p114_p3), %v278_v0  ;;  %v284_v3 = vld [vmem:[%s265_s16 + $0x28] sm:$0xff] (%p114_p3) }
  0x12   : > { %281 = vst [vmem:[%s262_s17 + $0x8] sm:$0xff] %v280_v1  ;;  %v286_v4 = vld [vmem:[%s265_s16 + $0x40] sm:$0xff]  ;;  %v288_v5 = vld [vmem:[%s265_s16 + $0x48] sm:$0xff] }
  0x13   : > { %283 = vst [vmem:[%s262_s17 + $0x10] sm:$0xff] %v282_v2  ;;  %v290_v6 = vld [vmem:[%s265_s16 + $0x60] sm:$0xff]  ;;  %v292_v7 = vld [vmem:[%s265_s16 + $0x68] sm:$0xff] }
  0x14   : > { %285 = vst [vmem:[%s262_s17 + $0x18] sm:$0xff] %v284_v3 }
  0x15   : > { %287 = vst [vmem:[%s262_s17 + $0x20] sm:$0xff] %v286_v4 }
  0x16   : > { %289 = vst [vmem:[%s262_s17 + $0x28] sm:$0xff] %v288_v5 }
  0x17   : > { %291 = vst [vmem:[%s262_s17 + $0x30] sm:$0xff] %v290_v6 }
  0x18   : > { %293 = vst [vmem:[%s262_s17 + $0x38] sm:$0xff] %v292_v7 }
  0x19 PF: > { %p775_p6 = scmp.ge.s32.totalorder %s929_s28, 1  ;;  %p315_p7 = scmp.lt.s32.totalorder %s929_s28, 3 }
  0x1b   : > { %p316_p8 = pnand %p775_p6, %p315_p7 }
  0x1c   : > { %s322_s18 = sand.u32 (!%p316_p8), 1, %s913_s24   ;;  %s777_s19 = sshll.u32 (!%p316_p8), %s921_s26, 1 }
  0x1d   : > { %319 = sbr.rel (%p316_p8) target bundleno = 640 (0x280), region = 67  ;;  %s776_s20 = sshll.u32 (!%p316_p8), %s322_s18, 6 }
  0x1e   : > { %p370_p9 = scmp.lt.s32.totalorder (!%p316_p8), %s777_s19, 3  ;;  %s778_s21 = sshll.u32 (!%p316_p8), %s921_s26, 5 }
  0x1f   : > { %p375_p10 = scmp.lt.s32.totalorder (!%p316_p8), %s778_s21, 63  ;;  %s1036_s24 = scalar_lea.vmem (!%p316_p8), [#allocation4], %s776_s20 }
  0x20   : > { %p780_p11 = scmp.ne.s32.totalorder (!%p316_p8), %s921_s26, 0 }
  0x22   : > { %s1157_s19 = smov (!%p370_p9, %s777_s19), 3  ;;  %s1159_s21 = smov (!%p375_p10, %s778_s21), 63 }
  0x23   : > { %s372_s8 = scalar_lea.vmem %s1146_s4, %s1157_s19  ;;  %s779_s9 = sshll.u32 %s1159_s21, 3 }
  0x24   : > { %s1034_s13 = scalar_lea.vmem %s1147_s5, %s779_s9  ;;  %384 = sbr.rel (%p780_p11) target bundleno = 319 (0x13f), region = 75 }
  0x29   : > { %v385_v8 = vld [vmem:[%s1142_s0] sm:$0xff]  ;;  %vm389_vm0 = vcmask 261120   ;;  %v931_v10 = vmov 0.0   ;;  %v386_v11 = vld [vmem:[%s1142_s0 + $0x8] sm:$0xff]  ;;  %v932_v13 = vmov 32.0  }
  0x2a   : > { %v390_v9 = vsel %vm389_vm0, %v385_v8, 0.0  ;;  %453 = vst.msk [vmem:[#allocation3] sm:$0xff] %vm389_vm0, %v931_v10  ;;  %v393_v12 = vsel %vm389_vm0, %v386_v11, 0.0  ;;  %844 = vrcp.f32 %v932_v13  ;;  %v842_v44 = vld [vmem:[%s1143_s1] ss:$0 sm:$0xff] }
  0x2b   : > { %454 = vst.msk [vmem:[#allocation3 + $0x8] sm:$0xff] %vm389_vm0, %v931_v10  ;;  %391 = vadd.xlane.f32.xlu0 %v390_v9  ;;  %v843_v47 = vld [vmem:[%s1144_s2] ss:$0 sm:$0xff] }
  0x30   : > { %v845_v14 = vpop.eup %844 }
  0x31   : > { %v397_v15 = vmul.f32 32.0, %v845_v14  ;;  %vm401_vm1 = vweird.f32 %v845_v14 }
  0x33   : > { %394 = vadd.xlane.f32.xlu0 %v393_v12  ;;  %v398_v16 = vsub.f32 1.0, %v397_v15 }
  0x35   : > { %v399_v17 = vmul.f32 %v845_v14, %v398_v16 }
  0x37   : > { %v400_v18 = vadd.f32 %v845_v14, %v399_v17 }
  0x39   : > { %v402_v19 = vsel %vm401_vm1, %v845_v14, %v400_v18 }
  0x9e   : > { %v392_v20 = vpop.xlane.xlu0 %391 }
  0x9f   : > { %v403_v21 = vmul.f32 %v402_v19, %v392_v20 }
  0xa1   : > { %v405_v22 = vsub.f32 %v385_v8, %v403_v21 }
  0xa3   : > { %v407_v23 = vmul.f32 %v405_v22, %v405_v22 }
  0xa5   : > { %v409_v24 = vsel %vm389_vm0, %v407_v23, 0.0 }
  0xa6   : > { %410 = vadd.xlane.f32.xlu1 %v409_v24  ;;  %v395_v25 = vpop.xlane.xlu0 %394 }
  0xa7   : > { %v404_v26 = vmul.f32 %v402_v19, %v395_v25 }
  0xa9   : > { %v406_v27 = vsub.f32 %v386_v11, %v404_v26 }
  0xab   : > { %v408_v28 = vmul.f32 %v406_v27, %v406_v27 }
  0xad   : > { %v412_v29 = vsel %vm389_vm0, %v408_v28, 0.0 }
  0xae   : > { %413 = vadd.xlane.f32.xlu1 %v412_v29 }
 0x119   : > { %v411_v30 = vpop.xlane.xlu1 %410 }
 0x11a   : > { %v415_v31 = vmul.f32 %v411_v30, %v402_v19 }
 0x11c   : > { %v417_v32 = vadd.f32 1e-06, %v415_v31 }
 0x11e   : > { %846 = vrsqrt.f32 %v417_v32  ;;  %vm425_vm3 = vweird.f32 %v417_v32 }
 0x121   : > { %v414_v33 = vpop.xlane.xlu1 %413 }
 0x122   : > { %v416_v34 = vmul.f32 %v414_v33, %v402_v19 }
 0x124   : > { %v847_v35 = vpop.eup %846  ;;  %v418_v36 = vadd.f32 1e-06, %v416_v34 }
 0x125   : > { %v420_v37 = vmul.f32 %v847_v35, %v417_v32  ;;  %vm426_vm2 = vweird.f32 %v847_v35 }
 0x126   : > { %848 = vrsqrt.f32 %v418_v36  ;;  %vm427_vm4 = vmor %vm425_vm3, %vm426_vm2  ;;  %vm435_vm6 = vweird.f32 %v418_v36 }
 0x127   : > { %v421_v38 = vmul.f32 %v847_v35, %v420_v37 }
 0x129   : > { %v422_v39 = vmul.f32 0.5, %v421_v38 }
 0x12b   : > { %v423_v40 = vsub.f32 1.5, %v422_v39 }
 0x12c   : > { %v849_v41 = vpop.eup %848 }
 0x12d   : > { %v424_v42 = vmul.f32 %v847_v35, %v423_v40  ;;  %v430_v43 = vmul.f32 %v849_v41, %v418_v36  ;;  %vm436_vm5 = vweird.f32 %v849_v41 }
 0x12e   : > { %vm437_vm7 = vmor %vm435_vm6, %vm436_vm5 }
 0x12f   : > { %v428_v45 = vsel %vm427_vm4, %v847_v35, %v424_v42  ;;  %v431_v46 = vmul.f32 %v849_v41, %v430_v43 }
 0x130   : > { %v439_v48 = vmul.f32 %v428_v45, %v405_v22 }
 0x131   : > { %v432_v49 = vmul.f32 0.5, %v431_v46 }
 0x132   : > { %v444_v50 = vmul.f32 %v842_v44, %v439_v48 }
 0x133   : > { %v433_v51 = vsub.f32 1.5, %v432_v49 }
 0x134   : > { %v449_v52 = vadd.f32 %v843_v47, %v444_v50 }
 0x135   : > { %v434_v53 = vmul.f32 %v849_v41, %v433_v51 }
 0x136   : > { %451 = vst.msk [vmem:[#allocation2] sm:$0xff] %vm389_vm0, %v449_v52 }
 0x137   : > { %v438_v54 = vsel %vm437_vm7, %v849_v41, %v434_v53 }
 0x138   : > { %v440_v55 = vmul.f32 %v438_v54, %v406_v27 }
 0x13a   : > { %v445_v56 = vmul.f32 %v842_v44, %v440_v55 }
 0x13c   : > { %v450_v57 = vadd.f32 %v843_v47, %v445_v56 }
 0x13e   : > { %452 = vst.msk [vmem:[#allocation2 + $0x8] sm:$0xff] %vm389_vm0, %v450_v57 }
 0x13f PF: > { %v463_v58 = vld [vmem:[%s1036_s24 + $0x30] sm:$0xff]  ;;  %v464_v59 = vld [vmem:[%s1036_s24 + $0x38] sm:$0xff]  ;;  %v461_v60 = vld [vmem:[%s1036_s24 + $0x20] sm:$0xff]  ;;  %vm471_vm8 = vcmask 261120   ;;  %p785_p12 = scmp.ne.s32.totalorder %s921_s26, 1 }
 0x140   : > { %490 = vmatpush.msra.mxu0 %v463_v58  ;;  %513 = vmatpush.msra.mxu1 %v464_v59  ;;  %v462_v61 = vld [vmem:[%s1036_s24 + $0x28] sm:$0xff]  ;;  %v459_v62 = vld [vmem:[%s1036_s24 + $0x10] sm:$0xff]  ;;  %v460_v63 = vld [vmem:[%s1036_s24 + $0x18] sm:$0xff] }
 0x141   : > { %v457_v0 = vld [vmem:[%s1036_s24] sm:$0xff]  ;;  %v577_v1 = vld [vmem:[%s1034_s13 + $0x78] sm:$0xff]  ;;  %v458_v3 = vld [vmem:[%s1036_s24 + $0x8] sm:$0xff] }
 0x142   : > { %491 = vmatpush.msra.mxu0 %v461_v60  ;;  %514 = vmatpush.msra.mxu1 %v462_v61  ;;  %v593_v2 = vld [vmem:[%s1034_s13 + $0xf8] sm:$0xff]  ;;  %v576_v4 = vld [vmem:[%s1034_s13 + $0x70] sm:$0xff]  ;;  %v455_v6 = vld [vmem:[#allocation2] sm:$0xff] }
 0x143   : > { %594 = vmatpush.msra.mxu2 %v577_v1  ;;  %617 = vmatpush.msra.mxu3 %v593_v2  ;;  %v592_v5 = vld [vmem:[%s1034_s13 + $0xf0] sm:$0xff]  ;;  %v575_v7 = vld [vmem:[%s1034_s13 + $0x68] sm:$0xff]  ;;  %v574_v9 = vld [vmem:[%s1034_s13 + $0x60] sm:$0xff] }
 0x144   : > { %492 = vmatpush.msra.mxu0 %v459_v62  ;;  %515 = vmatpush.msra.mxu1 %v460_v63  ;;  %v591_v8 = vld [vmem:[%s1034_s13 + $0xe8] sm:$0xff]  ;;  %v590_v10 = vld [vmem:[%s1034_s13 + $0xe0] sm:$0xff]  ;;  %v573_v12 = vld [vmem:[%s1034_s13 + $0x58] sm:$0xff] }
 0x145   : > { %595 = vmatpush.msra.mxu2 %v576_v4  ;;  %618 = vmatpush.msra.mxu3 %v592_v5  ;;  %v456_v11 = vld [vmem:[#allocation2 + $0x8] sm:$0xff]  ;;  %v589_v13 = vld [vmem:[%s1034_s13 + $0xd8] sm:$0xff]  ;;  %v572_v14 = vld [vmem:[%s1034_s13 + $0x50] sm:$0xff] }
 0x146   : > { %493 = vmatpush.msra.mxu0 %v457_v0  ;;  %516 = vmatpush.msra.mxu1 %v458_v3  ;;  %v588_v15 = vld [vmem:[%s1034_s13 + $0xd0] sm:$0xff]  ;;  %v571_v16 = vld [vmem:[%s1034_s13 + $0x48] sm:$0xff]  ;;  %v570_v18 = vld [vmem:[%s1034_s13 + $0x40] sm:$0xff] }
 0x147   : > { %781 = vmatmul.msk.f32.vlgmr.msra.gmra.mxu0 %vm471_vm8, %v455_v6  ;;  %783 = vmatmul.msk.f32.vlgmr.msra.gmra.mxu1 %vm471_vm8, %v455_v6  ;;  %v587_v17 = vld [vmem:[%s1034_s13 + $0xc8] sm:$0xff]  ;;  %v586_v19 = vld [vmem:[%s1034_s13 + $0xc0] sm:$0xff]  ;;  %v569_v20 = vld [vmem:[%s1034_s13 + $0x38] sm:$0xff] }
 0x148   : > { %596 = vmatpush.msra.mxu2 %v575_v7  ;;  %619 = vmatpush.msra.mxu3 %v591_v8  ;;  %v585_v21 = vld [vmem:[%s1034_s13 + $0xb8] sm:$0xff]  ;;  %v568_v22 = vld [vmem:[%s1034_s13 + $0x30] sm:$0xff]  ;;  %v567_v24 = vld [vmem:[%s1034_s13 + $0x28] sm:$0xff] }
 0x149   : > { %v584_v23 = vld [vmem:[%s1034_s13 + $0xb0] sm:$0xff]  ;;  %v583_v25 = vld [vmem:[%s1034_s13 + $0xa8] sm:$0xff]  ;;  %v566_v26 = vld [vmem:[%s1034_s13 + $0x20] sm:$0xff] }
 0x14a   : > { %597 = vmatpush.msra.mxu2 %v574_v9  ;;  %620 = vmatpush.msra.mxu3 %v590_v10  ;;  %v582_v27 = vld [vmem:[%s1034_s13 + $0xa0] sm:$0xff]  ;;  %v565_v28 = vld [vmem:[%s1034_s13 + $0x18] sm:$0xff]  ;;  %v564_v30 = vld [vmem:[%s1034_s13 + $0x10] sm:$0xff] }
 0x14b   : > { %v581_v29 = vld [vmem:[%s1034_s13 + $0x98] sm:$0xff]  ;;  %v580_v31 = vld [vmem:[%s1034_s13 + $0x90] sm:$0xff]  ;;  %v563_v32 = vld [vmem:[%s1034_s13 + $0x8] sm:$0xff] }
 0x14c   : > { %598 = vmatpush.msra.mxu2 %v573_v12  ;;  %621 = vmatpush.msra.mxu3 %v589_v13  ;;  %v579_v33 = vld [vmem:[%s1034_s13 + $0x88] sm:$0xff]  ;;  %v562_v34 = vld [vmem:[%s1034_s13] sm:$0xff] }
 0x14d   : > { %v578_v35 = vld [vmem:[%s1034_s13 + $0x80] sm:$0xff] }
 0x14e   : > { %599 = vmatpush.msra.mxu2 %v572_v14  ;;  %622 = vmatpush.msra.mxu3 %v588_v15  ;;  %v465_v36 = vld [vmem:[%s372_s8] sm:$0x3] }
 0x14f   : > { %782 = vmatmul.msk.f32.gmra.mxu0 %vm471_vm8, %v456_v11  ;;  %784 = vmatmul.msk.f32.gmra.mxu1 %vm471_vm8, %v456_v11  ;;  %v467_v37 = vperm.slane %v465_v36, 0  ;;  %v468_v38 = vperm.slane %v465_v36, 1 }
 0x150   : > { %600 = vmatpush.msra.mxu2 %v571_v16  ;;  %623 = vmatpush.msra.mxu3 %v587_v17 }
 0x152   : > { %601 = vmatpush.msra.mxu2 %v570_v18  ;;  %624 = vmatpush.msra.mxu3 %v586_v19 }
 0x154   : > { %602 = vmatpush.msra.mxu2 %v569_v20  ;;  %625 = vmatpush.msra.mxu3 %v585_v21  ;;  %v560_v20 = vld [vmem:[#allocation3] sm:$0xff] }
 0x156   : > { %603 = vmatpush.msra.mxu2 %v568_v22  ;;  %626 = vmatpush.msra.mxu3 %v584_v23 }
 0x158   : > { %604 = vmatpush.msra.mxu2 %v567_v24  ;;  %627 = vmatpush.msra.mxu3 %v583_v25  ;;  %v561_v25 = vld [vmem:[#allocation3 + $0x8] sm:$0xff] }
 0x15a   : > { %605 = vmatpush.msra.mxu2 %v566_v26  ;;  %628 = vmatpush.msra.mxu3 %v582_v27 }
 0x15c   : > { %606 = vmatpush.msra.mxu2 %v565_v28  ;;  %629 = vmatpush.msra.mxu3 %v581_v29 }
 0x15e   : > { %607 = vmatpush.msra.mxu2 %v564_v30  ;;  %630 = vmatpush.msra.mxu3 %v580_v31 }
 0x160   : > { %608 = vmatpush.msra.mxu2 %v563_v32  ;;  %631 = vmatpush.msra.mxu3 %v579_v33 }
 0x162   : > { %609 = vmatpush.msra.mxu2 %v562_v34  ;;  %632 = vmatpush.msra.mxu3 %v578_v35 }
 0x1c4   : > { %v495_v39 = vpop.f32.mrf.mxu0  ;;  %v518_v40 = vpop.f32.mrf.mxu1 }
 0x1c5   : > { %v496_v41 = vadd.f32 %v495_v39, %v467_v37  ;;  %v519_v42 = vadd.f32 %v518_v40, %v468_v38 }
 0x1c7   : > { %v528_v43 = vmul.f32 0.044715, %v496_v41  ;;  %v529_v44 = vmul.f32 0.044715, %v519_v42  ;;  %v524_v3 = vmul.f32 0.5, %v496_v41  ;;  %v525_v7 = vmul.f32 0.5, %v519_v42 }
 0x1c9   : > { %v532_v45 = vmul.f32 %v528_v43, %v496_v41  ;;  %v533_v46 = vmul.f32 %v529_v44, %v519_v42 }
 0x1cb   : > { %v536_v47 = vmul.f32 %v532_v45, %v496_v41  ;;  %v537_v48 = vmul.f32 %v533_v46, %v519_v42 }
 0x1cc   : > { %v498_v49 = vpop.f32.mrf.mxu0  ;;  %v521_v50 = vpop.f32.mrf.mxu1 }
 0x1cd   : > { %v499_v51 = vadd.f32 %v498_v49, %v467_v37  ;;  %v522_v52 = vadd.f32 %v521_v50, %v468_v38  ;;  %v540_v53 = vadd.f32 %v536_v47, %v496_v41  ;;  %v541_v54 = vadd.f32 %v537_v48, %v519_v42 }
 0x1cf   : > { %v544_v55 = vmul.f32 0.7978846, %v540_v53  ;;  %v545_v56 = vmul.f32 0.7978846, %v541_v54  ;;  %v530_v57 = vmul.f32 0.044715, %v499_v51 }
 0x1d0   : > { %v531_v58 = vmul.f32 0.044715, %v522_v52  ;;  %v526_v13 = vmul.f32 0.5, %v499_v51  ;;  %v527_v15 = vmul.f32 0.5, %v522_v52 }
 0x1d1   : > { %850 = vtanh.f32 %v544_v55  ;;  %v534_v59 = vmul.f32 %v530_v57, %v499_v51 }
 0x1d2   : > { %852 = vtanh.f32 %v545_v56  ;;  %v535_v60 = vmul.f32 %v531_v58, %v522_v52 }
 0x1d3   : > { %v538_v61 = vmul.f32 %v534_v59, %v499_v51 }
 0x1d4   : > { %v539_v62 = vmul.f32 %v535_v60, %v522_v52 }
 0x1d5   : > { %v542_v63 = vadd.f32 %v538_v61, %v499_v51 }
 0x1d6   : > { %v543_v0 = vadd.f32 %v539_v62, %v522_v52 }
 0x1d7   : > { %v851_v1 = vpop.eup %850  ;;  %v546_v5 = vmul.f32 0.7978846, %v542_v63 }
 0x1d8   : > { %v853_v2 = vpop.eup %852  ;;  %v552_v4 = vadd.f32 1.0, %v851_v1  ;;  %v547_v6 = vmul.f32 0.7978846, %v543_v0 }
 0x1d9   : > { %v553_v8 = vadd.f32 1.0, %v853_v2  ;;  %854 = vtanh.f32 %v546_v5 }
 0x1da   : > { %v556_v9 = vmul.f32 %v552_v4, %v524_v3  ;;  %856 = vtanh.f32 %v547_v6 }
 0x1db   : > { %v557_v10 = vmul.f32 %v553_v8, %v525_v7 }
 0x1dc   : > { %610 = vmatmul.f32.vlgmr.msra.gmra.mxu2 %v556_v9 }
 0x1dd   : > { %633 = vmatmul.f32.vlgmr.msra.gmra.mxu3 %v557_v10 }
 0x1df   : > { %v855_v11 = vpop.eup %854 }
 0x1e0   : > { %v857_v12 = vpop.eup %856  ;;  %v554_v14 = vadd.f32 1.0, %v855_v11 }
 0x1e1   : > { %v555_v16 = vadd.f32 1.0, %v857_v12 }
 0x1e2   : > { %v558_v17 = vmul.f32 %v554_v14, %v526_v13 }
 0x1e3   : > { %v559_v18 = vmul.f32 %v555_v16, %v527_v15 }
 0x1e4   : > { %613 = vmatmul.f32.gmra.mxu2 %v558_v17 }
 0x1e5   : > { %636 = vmatmul.f32.gmra.mxu3 %v559_v18 }
 0x25f   : > { %v611_v19 = vpop.f32.mrf.mxu2 }
 0x260   : > { %v634_v21 = vpop.f32.mrf.mxu3 }
 0x261   : > { %v635_v22 = vadd.f32 %v634_v21, %v611_v19 }
 0x263   : > { %v640_v23 = vadd.f32 %v635_v22, %v560_v20 }
 0x265   : > { %642 = vst.msk [vmem:[#allocation3] sm:$0xff] %vm471_vm8, %v640_v23 }
 0x267   : > { %v614_v24 = vpop.f32.mrf.mxu2 }
 0x268   : > { %v637_v26 = vpop.f32.mrf.mxu3 }
 0x269   : > { %v638_v27 = vadd.f32 %v637_v26, %v614_v24  ;;  %647 = sbr.rel (%p785_p12) target bundleno = 634 (0x27a), region = 79 }
 0x26b   : > { %v641_v28 = vadd.f32 %v638_v27, %v561_v25 }
 0x26d   : > { %643 = vst.msk [vmem:[#allocation3 + $0x8] sm:$0xff] %vm471_vm8, %v641_v28 }
 0x26e   : > { %v648_v29 = vld [vmem:[#allocation3] sm:$0xff]  ;;  %v858_v30 = vld [vmem:[%s1148_s6] ss:$0 sm:$0xff]  ;;  %v657_v33 = vld [vmem:[%s1142_s0 + $0x8] sm:$0xff] }
 0x26f   : > { %v656_v31 = vld [vmem:[%s1142_s0] sm:$0xff]  ;;  %v654_v34 = vadd.f32 %v858_v30, %v648_v29 }
 0x271   : > { %v658_v36 = vadd.f32 %v656_v31, %v654_v34 }
 0x273   : > { %660 = vst.msk [vmem:[#allocation5] sm:$0xff] %vm471_vm8, %v658_v36 }
 0x274   : > { %v649_v32 = vld [vmem:[#allocation3 + $0x8] sm:$0xff] }
 0x275   : > { %v655_v35 = vadd.f32 %v858_v30, %v649_v32 }
 0x277   : > { %v659_v37 = vadd.f32 %v657_v33, %v655_v35 }
 0x279   : > { %661 = vst.msk [vmem:[#allocation5 + $0x8] sm:$0xff] %vm471_vm8, %v659_v37 }
 0x27a PF: > { %p795_p13 = scmp.eq.s32.totalorder %s768_s29, 1  ;;  %s672_s15 = sshll.u32 %s1149_s7, 4  ;;  %s673_s15 = int_to_ptr.hbm [resolvable:$true] %s672_s15 }
 0x27b   : > { %s933_s16 = smov [#allocation5]   ;;  %s934_s18 = smov 128  }
 0x27c   : > { %s670_s17 = sshll.u32 %s933_s16, 4  ;;  %s935_s20 = smov 8   ;;  %s671_s17 = int_to_ptr.vmem [resolvable:$true] %s670_s17 }
 0x27d   : > { %792 = dma.vmem_to_hbm [thread:$0]  (%p795_p13), %s671_s17, 256, %s673_s15, [#allocation6], %s934_s18, %s934_s18, %s935_s20  }
 0x27e   : > { %908 = dma.done.wait (%p795_p13), [#allocation6], 256  }
 0x27f   : > { %910 = vsyncadd (%p795_p13), [#allocation6], 4294967040 }
 0x280 PF: > { %s18_s28 = sadd.s32 1, %s929_s28   ;;  %s1150_s24 = smov %s917_s25 }
 0x281   : > { %p15_p0 = scmp.ge.s32.totalorder %s18_s28, 4   ;;  %s1151_s25 = smov %s1012_s10 }
 0x282   : > { %s1152_s26 = smov %s925_s27  ;;  %s1153_s27 = smov %s1155_s30 }
 0x283   :  { %17 = sbr.rel (!%p15_p0) target bundleno = 3 (0x3), region = 121 }
 0x288   :  { %689 = vsyncpa [#allocation6], 1 }
 0x289   :  { %691 = vsyncpa [#allocation6 + $0x1], 1 }

</bundles_post_ra>
